<compile_context>
chip_gen: v6e
topology: v6e:2x2x1
jax: 0.10.0
libtpu: 0.0.40
codegen_flags: <defaults>
</compile_context>

<pallas_src>
import numpy as np
import jax
import jax.numpy as jnp
from jax.experimental import pallas as pl
from jax.experimental.pallas import tpu as pltpu

LAYERS = (16, 16, 8)     # embeddings_dim
HID = 16                 # z lane offset inside the 128-lane fused slabs (>= max hidden width)
TPAD = 128               # lane-dense slab width (exactly one MXU lane group)


def _gelu_tanh(v):
    # TODO(synk): PyTorch nn.GELU defaults to erf-exact; tanh approximation (diff <1e-3).
    c = 0.7978845608028654  # sqrt(2/pi)
    return 0.5 * v * (1.0 + jnp.tanh(c * (v + 0.044715 * v * v * v)))


def _kernel(x_ref, adj_ref, seg_ref,
            w0_ref, b0_ref, l0s_ref, c0s_ref,
            w1c_ref, b1c_ref, w2c_ref, b2c_ref,
            out_ref, zsum_ref, xfin_ref):
    f32 = jnp.float32
    bf16 = jnp.bfloat16

    def bdot(a, b):   # bf16 operands, f32 accumulation -> native MXU rate on all chips
        return jnp.dot(a, b, preferred_element_type=f32)

    adj = adj_ref[...]                                              # [N, N] bf16 (A + I)

    # ---- layer 0: first_h = Linear -> BN(eval, folded) -> GELU
    h0 = _gelu_tanh(bdot(x_ref[...], w0_ref[...]) + b0_ref[...])    # [N, 16] f32
    h0b = h0.astype(bf16)
    # linears[0] head (Linear -> GELU), placed at lanes [HID, HID+dt); gelu(0)=0 elsewhere
    z0s = _gelu_tanh(bdot(h0b, l0s_ref[...]) + c0s_ref[...])        # [N, 128]

    # ---- layer 1: GINConv(nn = Linear -> BN, eps=0) -> nn((A+I) @ h0)
    # fused [16,128] weight: h1 in lanes [0,16), z1 in lanes [HID,HID+dt) -> one MXU push
    agg1 = bdot(adj, h0b)                                           # [N, 16] f32
    hz1 = bdot(agg1.astype(bf16), w1c_ref[...]) + b1c_ref[...]      # [N, 128]
    h1b = hz1[:, :HID].astype(bf16)                                 # [N, 16]

    # ---- layer 2: GINConv; h2 in lanes [0,8), z2 in lanes [HID,HID+dt)
    agg2 = bdot(adj, h1b)                                           # [N, 16] f32
    hz2 = bdot(agg2.astype(bf16), w2c_ref[...]) + b2c_ref[...]      # [N, 128]

    # lane-dense single stores; wrapper slices the logical widths back out
    # (z lanes are exact; other lanes carry h values / zeros and are never exposed)
    zsum_ref[...] = z0s + hz1 + hz2                                 # Z
    xfin_ref[...] = hz2                                             # final x (lanes [0,8))

    # ---- out = sum over layers of global_max_pool(z_layer, batch); dropout p=0.0.
    # Segment max per graph: membership test on an [N,1] graph-id column + sublane
    # (XLU) max reduce.  No [G,N,128] broadcast, no pen relayout, no extra VMEM.
    # Note: an empty graph segment yields ~-3e30 (not an error), unlike PyG.
    seg = seg_ref[...]                                              # [N, 1] int32
    num_graphs = out_ref.shape[0]

    def pool_body(g, carry):
        neg = jnp.where(seg == g, 0.0, -1e30)                       # [N, 1] f32
        m0 = jnp.max(z0s + neg, axis=0, keepdims=True)              # [1, 128]
        m1 = jnp.max(hz1 + neg, axis=0, keepdims=True)
        m2 = jnp.max(hz2 + neg, axis=0, keepdims=True)
        out_ref[pl.ds(g, 1), :] = m0 + m1 + m2
        return carry

    jax.lax.fori_loop(0, num_graphs, pool_body, 0, unroll=True)


def fold_params(params):
    """Host-side, once per model (cache across calls): fold eval-mode BatchNorm1d into
    the Linears, fuse each GIN layer's head into a single <=128-lane slab, pre-cast
    MXU operands to bf16."""
    bf16, f32 = jnp.bfloat16, jnp.float32
    dt = params["l0"].shape[1]
    assert dt <= TPAD - HID

    def fold(i):  # w' = w*s, b' = b*s + t  (exact algebra for eval-mode BN)
        wp = params[f"w{i}"] * params[f"s{i}"]
        bp = params[f"b{i}"] * params[f"s{i}"] + params[f"t{i}"]
        return wp, bp

    def slab(h_part, z_part):
        rows = z_part.shape[0]
        s = jnp.zeros((rows, TPAD), f32)
        if h_part is not None:
            s = s.at[:, :h_part.shape[1]].set(h_part)
        return s.at[:, HID:HID + z_part.shape[1]].set(z_part)

    w0p, b0p = fold(0)
    w1p, b1p = fold(1)
    w2p, b2p = fold(2)

    return {
        "dim_target": dt,
        "w0": w0p.astype(bf16),
        "b0": b0p.astype(f32),
        "l0s": slab(None, params["l0"]).astype(bf16),
        "c0s": slab(None, params["c0"]).astype(f32),
        "w1c": slab(w1p, w1p @ params["l1"]).astype(bf16),
        "b1c": slab(b1p, b1p @ params["l1"] + params["c1"]).astype(f32),
        "w2c": slab(w2p, w2p @ params["l2"]).astype(bf16),
        "b2c": slab(b2p, b2p @ params["l2"] + params["c2"]).astype(f32),
    }


def gnn_forward(x, edge_index, batch, prepared, num_graphs):
    n, f = x.shape
    dt = prepared["dim_target"]

    # Glue: dense adjacency with self-loops (GINConv eps=0: x_i + sum_j x_j).
    # Small exact integer counts are exactly representable in bf16.
    # TODO(synk): for large N, stream adj row tiles (pl.ANY + make_async_copy) or use an
    # edge-list segment-sum, with a node-row grid, instead of dense all-in-VMEM adj.
    adj = jnp.zeros((n, n), jnp.float32).at[edge_index[1], edge_index[0]].add(1.0)
    adj_hat = (adj + jnp.eye(n, dtype=jnp.float32)).astype(jnp.bfloat16)
    seg = batch.astype(jnp.int32).reshape(n, 1)

    args = (x.astype(jnp.bfloat16), adj_hat, seg,
            prepared["w0"], prepared["b0"], prepared["l0s"], prepared["c0s"],
            prepared["w1c"], prepared["b1c"], prepared["w2c"], prepared["b2c"])

    # Advisory cost estimate for XLA scheduling around the custom call.
    mm_flops = (2 * n * f * HID + 2 * n * HID * TPAD            # layer 0 + its head
                + 2 * (2 * n * n * HID + 2 * n * HID * TPAD))   # 2 x (aggregation + fused head)
    bytes_accessed = (2 * n * n + 2 * n * f + 4 * n                       # adj, x, seg
                      + 2 * (f * HID + 3 * HID * TPAD) + 4 * (HID + 3 * TPAD)  # weights/biases
                      + 4 * (2 * n * TPAD + num_graphs * TPAD))           # outputs
    cost = pl.CostEstimate(flops=int(mm_flops),
                           transcendentals=int(n * (HID + TPAD)),
                           bytes_accessed=int(bytes_accessed))

    # VMEM limit sized to the resident footprint (inputs + outputs + f32 intermediates),
    # clamped to stay within every chip's physical VMEM (64 MiB on v7x).
    need = int(bytes_accessed + 12 * 4 * n * TPAD + (1 << 20))
    vmem_limit = int(min(max(need, 16 << 20), 64 << 20))

    vmem = pl.BlockSpec(memory_space=pltpu.MemorySpace.VMEM)
    out_p, z_p, xf_p = pl.pallas_call(
        _kernel,
        out_shape=(jax.ShapeDtypeStruct((num_graphs, TPAD), jnp.float32),  # out
                   jax.ShapeDtypeStruct((n, TPAD), jnp.float32),           # Z
                   jax.ShapeDtypeStruct((n, TPAD), jnp.float32)),          # final x
        in_specs=[vmem] * len(args),
        out_specs=(vmem, vmem, vmem),
        compiler_params=pltpu.CompilerParams(vmem_limit_bytes=vmem_limit),
        cost_estimate=cost,
    )(*args)

    # slice the lane-padded slabs back to logical widths (free wrapper plumbing)
    return (out_p[:, HID:HID + dt], z_p[:, HID:HID + dt], xf_p[:, :LAYERS[-1]])


def init_params(key, dim_features, dim_target):
    dims_in = (dim_features, LAYERS[0], LAYERS[1])
    params = {}
    keys = iter(jax.random.split(key, 32))
    for i, (din, dout) in enumerate(zip(dims_in, LAYERS)):
        params[f"w{i}"] = 0.2 * jax.random.normal(next(keys), (din, dout), jnp.float32)
        params[f"b{i}"] = 0.1 * jax.random.normal(next(keys), (1, dout), jnp.float32)
        gamma = 1.0 + 0.1 * jax.random.normal(next(keys), (1, dout), jnp.float32)
        beta = 0.1 * jax.random.normal(next(keys), (1, dout), jnp.float32)
        rmean = 0.1 * jax.random.normal(next(keys), (1, dout), jnp.float32)
        rvar = 1.0 + 0.1 * jnp.abs(jax.random.normal(next(keys), (1, dout), jnp.float32))
        scale = gamma / jnp.sqrt(rvar + 1e-5)          # folded eval-mode BatchNorm1d
        params[f"s{i}"] = scale
        params[f"t{i}"] = beta - rmean * scale
        params[f"l{i}"] = 0.2 * jax.random.normal(next(keys), (dout, dim_target), jnp.float32)
        params[f"c{i}"] = 0.1 * jax.random.normal(next(keys), (1, dim_target), jnp.float32)
    return params


def reference(x, adj_bf16, batch, p, num_graphs):
    # pure-JAX reference of the same math in UNFUSED form (validates the host-side
    # BN fold + head fusion); matmuls use the same bf16-operand / f32-acc precision.
    bf16 = jnp.bfloat16

    def bdot(a, b):
        return jnp.dot(a.astype(bf16), b.astype(bf16), preferred_element_type=jnp.float32)

    def fold(i):
        return p[f"w{i}"] * p[f"s{i}"], p[f"b{i}"] * p[f"s{i}"] + p[f"t{i}"]

    w0p, b0p = fold(0)
    w1p, b1p = fold(1)
    w2p, b2p = fold(2)

    def agg(h):
        return jnp.dot(adj_bf16, h.astype(bf16), preferred_element_type=jnp.float32)

    h0 = _gelu_tanh(bdot(x, w0p) + b0p)
    z0 = _gelu_tanh(bdot(h0, p["l0"]) + p["c0"])
    h1 = bdot(agg(h0), w1p) + b1p
    z1 = bdot(h1, p["l1"]) + p["c1"]
    h2 = bdot(agg(h1), w2p) + b2p
    z2 = bdot(h2, p["l2"]) + p["c2"]

    mask = batch[:, None] == jnp.arange(num_graphs)[None, :]      # [N, G]

    def pool(z):
        masked = jnp.where(mask.T[:, :, None], z[None], -1e30)
        return masked.max(axis=1)

    return pool(z0) + pool(z1) + pool(z2), z0 + z1 + z2, h2


if __name__ == "__main__":
    N_PER_G, G = 4, 3
    N = N_PER_G * G
    DIM_FEATURES, DIM_TARGET = 10, 5

    key = jax.random.PRNGKey(0)
    kx, kp = jax.random.split(key)
    x = jax.random.normal(kx, (N, DIM_FEATURES), jnp.float32)

    # bidirectional ring within each of the G graphs
    edges = []
    for g in range(G):
        base = g * N_PER_G
        for k in range(N_PER_G):
            a, b = base + k, base + (k + 1) % N_PER_G
            edges.append((a, b))
            edges.append((b, a))
    edge_index = jnp.asarray(np.array(edges, dtype=np.int32).T)            # [2, E]
    batch = jnp.asarray(np.repeat(np.arange(G, dtype=np.int32), N_PER_G))  # [N]

    params = init_params(kp, DIM_FEATURES, DIM_TARGET)
    prepared = fold_params(params)   # host-side fold/fuse, done once and cached

    out, Z, x_fin = gnn_forward(x, edge_index, batch, prepared, G)
    jax.block_until_ready((out, Z, x_fin))

    # light correctness check vs plain-JAX reference
    adj_hat = (jnp.zeros((N, N), jnp.float32)
               .at[edge_index[1], edge_index[0]].add(1.0)
               + jnp.eye(N, dtype=jnp.float32)).astype(jnp.bfloat16)
    ro, rz, rx = reference(x, adj_hat, batch, params, G)
    np.testing.assert_allclose(np.asarray(out), np.asarray(ro), rtol=2e-2, atol=3e-2)
    np.testing.assert_allclose(np.asarray(Z), np.asarray(rz), rtol=2e-2, atol=3e-2)
    np.testing.assert_allclose(np.asarray(x_fin), np.asarray(rx), rtol=2e-2, atol=3e-2)

    print("KERNEL_OK")
</pallas_src>

<mosaic_0001>
module attributes {stable_mosaic.version = 11 : i64} {
  func.func @_kernel(%arg0: memref<12x10xbf16, #tpu.memory_space<vmem>>, %arg1: memref<12x12xbf16, #tpu.memory_space<vmem>>, %arg2: memref<12x1xi32, #tpu.memory_space<vmem>>, %arg3: memref<10x16xbf16, #tpu.memory_space<vmem>>, %arg4: memref<1x16xf32, #tpu.memory_space<vmem>>, %arg5: memref<16x128xbf16, #tpu.memory_space<vmem>>, %arg6: memref<1x128xf32, #tpu.memory_space<vmem>>, %arg7: memref<16x128xbf16, #tpu.memory_space<vmem>>, %arg8: memref<1x128xf32, #tpu.memory_space<vmem>>, %arg9: memref<16x128xbf16, #tpu.memory_space<vmem>>, %arg10: memref<1x128xf32, #tpu.memory_space<vmem>>, %arg11: memref<3x128xf32, #tpu.memory_space<vmem>>, %arg12: memref<12x128xf32, #tpu.memory_space<vmem>>, %arg13: memref<12x128xf32, #tpu.memory_space<vmem>>) attributes {dimension_semantics = [], scalar_prefetch = 0 : i64, scratch_operands = 0 : i64, tpu.core_type = #tpu.core_type<tc>} {
    %c0 = arith.constant 0 : index
    %c0_0 = arith.constant 0 : index
    %0 = vector.load %arg1[%c0, %c0_0] : memref<12x12xbf16, #tpu.memory_space<vmem>>, vector<12x12xbf16>
    %c0_1 = arith.constant 0 : index
    %c0_2 = arith.constant 0 : index
    %1 = vector.load %arg0[%c0_1, %c0_2] : memref<12x10xbf16, #tpu.memory_space<vmem>>, vector<12x10xbf16>
    %c0_3 = arith.constant 0 : index
    %c0_4 = arith.constant 0 : index
    %2 = vector.load %arg3[%c0_3, %c0_4] : memref<10x16xbf16, #tpu.memory_space<vmem>>, vector<10x16xbf16>
    %cst = arith.constant dense<0.000000e+00> : vector<12x16xf32>
    %3 = tpu.matmul %1, %2, %cst {dimension_numbers = #tpu.dot_dimension_numbers<[1], [0], [0], [1], [0, 0, 1, 1], [], []>} : vector<12x10xbf16>, vector<10x16xbf16>, vector<12x16xf32> -> vector<12x16xf32>
    %c0_5 = arith.constant 0 : index
    %c0_6 = arith.constant 0 : index
    %4 = vector.load %arg4[%c0_5, %c0_6] : memref<1x16xf32, #tpu.memory_space<vmem>>, vector<1x16xf32>
    %5 = vector.broadcast %4 : vector<1x16xf32> to vector<12x16xf32>
    %6 = arith.addf %3, %5 : vector<12x16xf32>
    %cst_7 = arith.constant 5.000000e-01 : f32
    %7 = vector.broadcast %cst_7 : f32 to vector<12x16xf32>
    %8 = arith.mulf %7, %6 : vector<12x16xf32>
    %cst_8 = arith.constant 4.471500e-02 : f32
    %9 = vector.broadcast %cst_8 : f32 to vector<12x16xf32>
    %10 = arith.mulf %9, %6 : vector<12x16xf32>
    %11 = arith.mulf %10, %6 : vector<12x16xf32>
    %12 = arith.mulf %11, %6 : vector<12x16xf32>
    %13 = arith.addf %6, %12 : vector<12x16xf32>
    %cst_9 = arith.constant 0.797884583 : f32
    %14 = vector.broadcast %cst_9 : f32 to vector<12x16xf32>
    %15 = arith.mulf %14, %13 : vector<12x16xf32>
    %16 = math.tanh %15 : vector<12x16xf32>
    %cst_10 = arith.constant 1.000000e+00 : f32
    %17 = vector.broadcast %cst_10 : f32 to vector<12x16xf32>
    %18 = arith.addf %17, %16 : vector<12x16xf32>
    %19 = arith.mulf %8, %18 : vector<12x16xf32>
    %20 = arith.truncf %19 : vector<12x16xf32> to vector<12x16xbf16>
    %c0_11 = arith.constant 0 : index
    %c0_12 = arith.constant 0 : index
    %21 = vector.load %arg5[%c0_11, %c0_12] : memref<16x128xbf16, #tpu.memory_space<vmem>>, vector<16x128xbf16>
    %cst_13 = arith.constant dense<0.000000e+00> : vector<12x128xf32>
    %22 = tpu.matmul %20, %21, %cst_13 {dimension_numbers = #tpu.dot_dimension_numbers<[1], [0], [0], [1], [0, 0, 1, 1], [], []>} : vector<12x16xbf16>, vector<16x128xbf16>, vector<12x128xf32> -> vector<12x128xf32>
    %c0_14 = arith.constant 0 : index
    %c0_15 = arith.constant 0 : index
    %23 = vector.load %arg6[%c0_14, %c0_15] : memref<1x128xf32, #tpu.memory_space<vmem>>, vector<1x128xf32>
    %24 = vector.broadcast %23 : vector<1x128xf32> to vector<12x128xf32>
    %25 = arith.addf %22, %24 : vector<12x128xf32>
    %cst_16 = arith.constant 5.000000e-01 : f32
    %26 = vector.broadcast %cst_16 : f32 to vector<12x128xf32>
    %27 = arith.mulf %26, %25 : vector<12x128xf32>
    %cst_17 = arith.constant 4.471500e-02 : f32
    %28 = vector.broadcast %cst_17 : f32 to vector<12x128xf32>
    %29 = arith.mulf %28, %25 : vector<12x128xf32>
    %30 = arith.mulf %29, %25 : vector<12x128xf32>
    %31 = arith.mulf %30, %25 : vector<12x128xf32>
    %32 = arith.addf %25, %31 : vector<12x128xf32>
    %cst_18 = arith.constant 0.797884583 : f32
    %33 = vector.broadcast %cst_18 : f32 to vector<12x128xf32>
    %34 = arith.mulf %33, %32 : vector<12x128xf32>
    %35 = math.tanh %34 : vector<12x128xf32>
    %cst_19 = arith.constant 1.000000e+00 : f32
    %36 = vector.broadcast %cst_19 : f32 to vector<12x128xf32>
    %37 = arith.addf %36, %35 : vector<12x128xf32>
    %38 = arith.mulf %27, %37 : vector<12x128xf32>
    %cst_20 = arith.constant dense<0.000000e+00> : vector<12x16xf32>
    %39 = tpu.matmul %0, %20, %cst_20 {dimension_numbers = #tpu.dot_dimension_numbers<[1], [0], [0], [1], [0, 0, 1, 1], [], []>} : vector<12x12xbf16>, vector<12x16xbf16>, vector<12x16xf32> -> vector<12x16xf32>
    %40 = arith.truncf %39 : vector<12x16xf32> to vector<12x16xbf16>
    %c0_21 = arith.constant 0 : index
    %c0_22 = arith.constant 0 : index
    %41 = vector.load %arg7[%c0_21, %c0_22] : memref<16x128xbf16, #tpu.memory_space<vmem>>, vector<16x128xbf16>
    %cst_23 = arith.constant dense<0.000000e+00> : vector<12x128xf32>
    %42 = tpu.matmul %40, %41, %cst_23 {dimension_numbers = #tpu.dot_dimension_numbers<[1], [0], [0], [1], [0, 0, 1, 1], [], []>} : vector<12x16xbf16>, vector<16x128xbf16>, vector<12x128xf32> -> vector<12x128xf32>
    %c0_24 = arith.constant 0 : index
    %c0_25 = arith.constant 0 : index
    %43 = vector.load %arg8[%c0_24, %c0_25] : memref<1x128xf32, #tpu.memory_space<vmem>>, vector<1x128xf32>
    %44 = vector.broadcast %43 : vector<1x128xf32> to vector<12x128xf32>
    %45 = arith.addf %42, %44 : vector<12x128xf32>
    %46 = vector.extract_strided_slice %45 {offsets = [0, 0], sizes = [12, 16], strides = [1, 1]} : vector<12x128xf32> to vector<12x16xf32>
    %47 = arith.truncf %46 : vector<12x16xf32> to vector<12x16xbf16>
    %cst_26 = arith.constant dense<0.000000e+00> : vector<12x16xf32>
    %48 = tpu.matmul %0, %47, %cst_26 {dimension_numbers = #tpu.dot_dimension_numbers<[1], [0], [0], [1], [0, 0, 1, 1], [], []>} : vector<12x12xbf16>, vector<12x16xbf16>, vector<12x16xf32> -> vector<12x16xf32>
    %49 = arith.truncf %48 : vector<12x16xf32> to vector<12x16xbf16>
    %c0_27 = arith.constant 0 : index
    %c0_28 = arith.constant 0 : index
    %50 = vector.load %arg9[%c0_27, %c0_28] : memref<16x128xbf16, #tpu.memory_space<vmem>>, vector<16x128xbf16>
    %cst_29 = arith.constant dense<0.000000e+00> : vector<12x128xf32>
    %51 = tpu.matmul %49, %50, %cst_29 {dimension_numbers = #tpu.dot_dimension_numbers<[1], [0], [0], [1], [0, 0, 1, 1], [], []>} : vector<12x16xbf16>, vector<16x128xbf16>, vector<12x128xf32> -> vector<12x128xf32>
    %c0_30 = arith.constant 0 : index
    %c0_31 = arith.constant 0 : index
    %52 = vector.load %arg10[%c0_30, %c0_31] : memref<1x128xf32, #tpu.memory_space<vmem>>, vector<1x128xf32>
    %53 = vector.broadcast %52 : vector<1x128xf32> to vector<12x128xf32>
    %54 = arith.addf %51, %53 : vector<12x128xf32>
    %55 = arith.addf %38, %45 : vector<12x128xf32>
    %56 = arith.addf %55, %54 : vector<12x128xf32>
    %c0_32 = arith.constant 0 : index
    %c0_33 = arith.constant 0 : index
    %57 = vector.load %arg12[%c0_32, %c0_33] : memref<12x128xf32, #tpu.memory_space<vmem>>, vector<12x128xf32>
    tpu.vector_store %arg12[%c0_32, %c0_33], %56 {strides = array<i32>} : memref<12x128xf32, #tpu.memory_space<vmem>>, vector<12x128xf32>,
    %c0_34 = arith.constant 0 : index
    %c0_35 = arith.constant 0 : index
    %58 = vector.load %arg13[%c0_34, %c0_35] : memref<12x128xf32, #tpu.memory_space<vmem>>, vector<12x128xf32>
    tpu.vector_store %arg13[%c0_34, %c0_35], %54 {strides = array<i32>} : memref<12x128xf32, #tpu.memory_space<vmem>>, vector<12x128xf32>,
    %c0_36 = arith.constant 0 : index
    %c0_37 = arith.constant 0 : index
    %59 = vector.load %arg2[%c0_36, %c0_37] : memref<12x1xi32, #tpu.memory_space<vmem>>, vector<12x1xi32>
    %c0_i32 = arith.constant 0 : i32
    %60 = vector.broadcast %c0_i32 : i32 to vector<12x1xi32>
    %61 = arith.cmpi eq, %59, %60 : vector<12x1xi32>
    %cst_38 = arith.constant 0.000000e+00 : f32
    %cst_39 = arith.constant -1.000000e+30 : f32
    %62 = vector.broadcast %cst_38 : f32 to vector<12x1xf32>
    %63 = vector.broadcast %cst_39 : f32 to vector<12x1xf32>
    %64 = arith.select %61, %62, %63 : vector<12x1xi1>, vector<12x1xf32>
    %65 = vector.broadcast %64 : vector<12x1xf32> to vector<12x128xf32>
    %66 = arith.addf %38, %65 : vector<12x128xf32>
    %cst_40 = arith.constant dense<0xFF800000> : vector<128xf32>
    %67 = vector.multi_reduction <maximumf>, %66, %cst_40 [0] : vector<12x128xf32> to vector<128xf32>
    %68 = vector.shape_cast %67 : vector<128xf32> to vector<1x128xf32>
    %69 = vector.broadcast %64 : vector<12x1xf32> to vector<12x128xf32>
    %70 = arith.addf %45, %69 : vector<12x128xf32>
    %cst_41 = arith.constant dense<0xFF800000> : vector<128xf32>
    %71 = vector.multi_reduction <maximumf>, %70, %cst_41 [0] : vector<12x128xf32> to vector<128xf32>
    %72 = vector.shape_cast %71 : vector<128xf32> to vector<1x128xf32>
    %73 = vector.broadcast %64 : vector<12x1xf32> to vector<12x128xf32>
    %74 = arith.addf %54, %73 : vector<12x128xf32>
    %cst_42 = arith.constant dense<0xFF800000> : vector<128xf32>
    %75 = vector.multi_reduction <maximumf>, %74, %cst_42 [0] : vector<12x128xf32> to vector<128xf32>
    %76 = vector.shape_cast %75 : vector<128xf32> to vector<1x128xf32>
    %77 = arith.addf %68, %72 : vector<1x128xf32>
    %78 = arith.addf %77, %76 : vector<1x128xf32>
    %79 = arith.index_cast %c0_i32 : i32 to index
    %c0_43 = arith.constant 0 : index
    %80 = vector.load %arg11[%79, %c0_43] : memref<3x128xf32, #tpu.memory_space<vmem>>, vector<1x128xf32>
    tpu.vector_store %arg11[%79, %c0_43], %78 {strides = array<i32>} : memref<3x128xf32, #tpu.memory_space<vmem>>, vector<1x128xf32>,
    %c1_i32 = arith.constant 1 : i32
    %81 = vector.broadcast %c1_i32 : i32 to vector<12x1xi32>
    %82 = arith.cmpi eq, %59, %81 : vector<12x1xi32>
    %cst_44 = arith.constant 0.000000e+00 : f32
    %cst_45 = arith.constant -1.000000e+30 : f32
    %83 = vector.broadcast %cst_44 : f32 to vector<12x1xf32>
    %84 = vector.broadcast %cst_45 : f32 to vector<12x1xf32>
    %85 = arith.select %82, %83, %84 : vector<12x1xi1>, vector<12x1xf32>
    %86 = vector.broadcast %85 : vector<12x1xf32> to vector<12x128xf32>
    %87 = arith.addf %38, %86 : vector<12x128xf32>
    %cst_46 = arith.constant dense<0xFF800000> : vector<128xf32>
    %88 = vector.multi_reduction <maximumf>, %87, %cst_46 [0] : vector<12x128xf32> to vector<128xf32>
    %89 = vector.shape_cast %88 : vector<128xf32> to vector<1x128xf32>
    %90 = vector.broadcast %85 : vector<12x1xf32> to vector<12x128xf32>
    %91 = arith.addf %45, %90 : vector<12x128xf32>
    %cst_47 = arith.constant dense<0xFF800000> : vector<128xf32>
    %92 = vector.multi_reduction <maximumf>, %91, %cst_47 [0] : vector<12x128xf32> to vector<128xf32>
    %93 = vector.shape_cast %92 : vector<128xf32> to vector<1x128xf32>
    %94 = vector.broadcast %85 : vector<12x1xf32> to vector<12x128xf32>
    %95 = arith.addf %54, %94 : vector<12x128xf32>
    %cst_48 = arith.constant dense<0xFF800000> : vector<128xf32>
    %96 = vector.multi_reduction <maximumf>, %95, %cst_48 [0] : vector<12x128xf32> to vector<128xf32>
    %97 = vector.shape_cast %96 : vector<128xf32> to vector<1x128xf32>
    %98 = arith.addf %89, %93 : vector<1x128xf32>
    %99 = arith.addf %98, %97 : vector<1x128xf32>
    %100 = arith.index_cast %c1_i32 : i32 to index
    %c0_49 = arith.constant 0 : index
    %101 = vector.load %arg11[%100, %c0_49] : memref<3x128xf32, #tpu.memory_space<vmem>>, vector<1x128xf32>
    tpu.vector_store %arg11[%100, %c0_49], %99 {strides = array<i32>} : memref<3x128xf32, #tpu.memory_space<vmem>>, vector<1x128xf32>,
    %c2_i32 = arith.constant 2 : i32
    %102 = vector.broadcast %c2_i32 : i32 to vector<12x1xi32>
    %103 = arith.cmpi eq, %59, %102 : vector<12x1xi32>
    %cst_50 = arith.constant 0.000000e+00 : f32
    %cst_51 = arith.constant -1.000000e+30 : f32
    %104 = vector.broadcast %cst_50 : f32 to vector<12x1xf32>
    %105 = vector.broadcast %cst_51 : f32 to vector<12x1xf32>
    %106 = arith.select %103, %104, %105 : vector<12x1xi1>, vector<12x1xf32>
    %107 = vector.broadcast %106 : vector<12x1xf32> to vector<12x128xf32>
    %108 = arith.addf %38, %107 : vector<12x128xf32>
    %cst_52 = arith.constant dense<0xFF800000> : vector<128xf32>
    %109 = vector.multi_reduction <maximumf>, %108, %cst_52 [0] : vector<12x128xf32> to vector<128xf32>
    %110 = vector.shape_cast %109 : vector<128xf32> to vector<1x128xf32>
    %111 = vector.broadcast %106 : vector<12x1xf32> to vector<12x128xf32>
    %112 = arith.addf %45, %111 : vector<12x128xf32>
    %cst_53 = arith.constant dense<0xFF800000> : vector<128xf32>
    %113 = vector.multi_reduction <maximumf>, %112, %cst_53 [0] : vector<12x128xf32> to vector<128xf32>
    %114 = vector.shape_cast %113 : vector<128xf32> to vector<1x128xf32>
    %115 = vector.broadcast %106 : vector<12x1xf32> to vector<12x128xf32>
    %116 = arith.addf %54, %115 : vector<12x128xf32>
    %cst_54 = arith.constant dense<0xFF800000> : vector<128xf32>
    %117 = vector.multi_reduction <maximumf>, %116, %cst_54 [0] : vector<12x128xf32> to vector<128xf32>
    %118 = vector.shape_cast %117 : vector<128xf32> to vector<1x128xf32>
    %119 = arith.addf %110, %114 : vector<1x128xf32>
    %120 = arith.addf %119, %118 : vector<1x128xf32>
    %121 = arith.index_cast %c2_i32 : i32 to index
    %c0_55 = arith.constant 0 : index
    %122 = vector.load %arg11[%121, %c0_55] : memref<3x128xf32, #tpu.memory_space<vmem>>, vector<1x128xf32>
    tpu.vector_store %arg11[%121, %c0_55], %120 {strides = array<i32>} : memref<3x128xf32, #tpu.memory_space<vmem>>, vector<1x128xf32>,
    %c3_i32 = arith.constant 3 : i32
    return
  }
}

</mosaic_0001>

<bundles_post_ra>
// kernel: tpu_custom_call.1
= control target key start
LH: loop header
LB: loop body
LE: loop exit
PB: predicated region body
PF: predicated region fallthrough
CT: control target
= control target key end

     0   :  { %19 = vsyncpa [#allocation3], 0  ;;  %s1140_s0 = inlined_call_operand.vmem [shape: bf16[12,10], index: 0, kind: input, shape index: {}]   ;;  %s1141_s1 = inlined_call_operand.vmem [shape: bf16[12,12], index: 1, kind: input, shape index: {}]   ;;  %s1142_s2 = inlined_call_operand.vmem [shape: s32[12,1], index: 2, kind: input, shape index: {}]   ;;  %s1143_s3 = inlined_call_operand.hbm [shape: bf16[10,16], index: 3, kind: input, shape index: {}]   ;;  %s1144_s4 = inlined_call_operand.hbm [shape: f32[1,16], index: 4, kind: input, shape index: {}]   ;;  %s1145_s5 = inlined_call_operand.vmem [shape: bf16[16,128], index: 5, kind: input, shape index: {}]   ;;  %s1146_s6 = inlined_call_operand.vmem [shape: f32[1,128], index: 6, kind: input, shape index: {}]   ;;  %s1147_s7 = inlined_call_operand.hbm [shape: bf16[16,128], index: 7, kind: input, shape index: {}]   ;;  %s1148_s8 = inlined_call_operand.hbm [shape: f32[1,128], index: 8, kind: input, shape index: {}]   ;;  %s1149_s9 = inlined_call_operand.vmem [shape: bf16[16,128], index: 9, kind: input, shape index: {}]   ;;  %s1150_s10 = inlined_call_operand.vmem [shape: f32[1,128], index: 10, kind: input, shape index: {}]   ;;  %s1151_s11 = inlined_call_operand.hbm [shape: f32[3,128], index: 11, kind: output, shape index: {0}]   ;;  %s1152_s12 = inlined_call_operand.hbm [shape: f32[12,128], index: 12, kind: output, shape index: {1}]   ;;  %s1153_s13 = inlined_call_operand.hbm [shape: f32[12,128], index: 13, kind: output, shape index: {2}]  }
   0x1   :  { %20 = vsyncpa [#allocation6], 0 }
   0x2   :  { %21 = vsyncpa [#allocation9], 0 }
   0x3   :  { %22 = vsyncpa [#allocation4], 0 }
   0x4   :  { %23 = vsyncpa [#allocation12], 0  ;;  %s927_s25 = smov [#allocation5]   ;;  %s928_s27 = smov [#allocation2]  }
   0x5   :  { %s48_s26 = sshll.u32 %s927_s25, 4  ;;  %s35_s28 = sshll.u32 %s928_s27, 4  ;;  %s49_s26 = int_to_ptr.vmem [resolvable:$true] %s48_s26  ;;  %s36_s28 = int_to_ptr.vmem [resolvable:$true] %s35_s28 }
   0x6   :  { %s785_s29 = scalar_lea.vmem %s49_s26, 16  ;;  %s789_s30 = scalar_lea.vmem %s49_s26, 32 }
   0x7   :  { %p786_p0 = scmp.ne.s32.totalorder %s49_s26, %s785_s29  ;;  %p790_p1 = scmp.lt.s32.totalorder %s49_s26, %s49_s26 }
   0x8   :  { %p791_p2 = scmp.lt.s32.totalorder %s789_s30, %s785_s29 }
   0xa   :  { %p792_p3 = por %p791_p2, %p790_p1 }
   0xc   :  { %p793_p4 = pnand %p792_p3, %p786_p0 }
   0xe   :  { %796 = shalt.err (!%p793_p4)
}
   0xf   :  { %51 = dma.hbm_to_vmem [thread:$0]  %s1144_s4, 16, %s49_s26, [#allocation6]  }
  0x10   :  { %s805_s16 = scalar_lea.vmem %s36_s28, 128  ;;  %p810_p6 = scmp.lt.s32.totalorder %s36_s28, %s36_s28 }
  0x11   :  { %p806_p5 = scmp.ne.s32.totalorder %s36_s28, %s805_s16  ;;  %p811_p7 = scmp.lt.s32.totalorder %s805_s16, %s805_s16 }
  0x13   :  { %p812_p8 = por %p811_p7, %p810_p6 }
  0x15   :  { %p813_p9 = pnand %p812_p8, %p806_p5 }
  0x17   :  { %816 = shalt.err (!%p813_p9)
}
  0x18   :  { %s929_s17 = smov 64   ;;  %s930_s18 = smov 4  }
  0x19   :  { %41 = dma.hbm_to_vmem [thread:$0]  %s1143_s3, 128, %s36_s28, [#allocation3], %s929_s17, %s929_s17, %s930_s18  }
  0x1a   :  { %s931_s21 = smov [#allocation7]   ;;  %s932_s23 = smov [#allocation8]  }
  0x1b   :  { %s61_s22 = sshll.u32 %s931_s21, 4  ;;  %s74_s24 = sshll.u32 %s932_s23, 4  ;;  %s62_s22 = int_to_ptr.vmem [resolvable:$true] %s61_s22  ;;  %s75_s24 = int_to_ptr.vmem [resolvable:$true] %s74_s24 }
  0x1c   :  { %s825_s4 = scalar_lea.vmem %s62_s22, 128  ;;  %p830_p11 = scmp.lt.s32.totalorder %s62_s22, %s62_s22 }
  0x1d   :  { %p826_p10 = scmp.ne.s32.totalorder %s62_s22, %s825_s4  ;;  %p831_p12 = scmp.lt.s32.totalorder %s825_s4, %s825_s4 }
  0x1f   :  { %p832_p13 = por %p831_p12, %p830_p11 }
  0x21   :  { %p833_p0 = pnand %p832_p13, %p826_p10 }
  0x23   :  { %836 = shalt.err (!%p833_p0)
}
  0x24   :  { %67 = dma.hbm_to_vmem [thread:$0]  %s1147_s7, 128, %s62_s22, [#allocation6], %s929_s17, %s929_s17, %s930_s18  }
  0x25   :  { %s845_s27 = scalar_lea.vmem %s75_s24, 16  ;;  %s849_s3 = scalar_lea.vmem %s75_s24, 32 }
  0x26   :  { %p846_p1 = scmp.ne.s32.totalorder %s75_s24, %s845_s27  ;;  %p850_p2 = scmp.lt.s32.totalorder %s75_s24, %s75_s24 }
  0x27   :  { %p851_p3 = scmp.lt.s32.totalorder %s849_s3, %s845_s27 }
  0x29   :  { %p852_p4 = por %p851_p3, %p850_p2 }
  0x2b   :  { %p853_p5 = pnand %p852_p4, %p846_p1 }
  0x2d   :  { %856 = shalt.err (!%p853_p5)
}
  0x2e   :  { %77 = dma.hbm_to_vmem [thread:$0]  %s1148_s8, 16, %s75_s24, [#allocation9]  }
  0x2f   :  { %917 = dma.done.wait [#allocation3], 128  }
  0x30   :  { %918 = vsyncadd [#allocation3], 4294967168 }
  0x31   :  { %919 = dma.done.wait [#allocation6], 144  }
  0x32   :  { %920 = vsyncadd [#allocation6], 4294967152 }
  0x33   :  { %921 = dma.done.wait [#allocation9], 16  }
  0x34   :  { %922 = vsyncadd [#allocation9], 4294967280  ;;  %v933_v0 = vmov 0.0   ;;  %vm934_vm0 = vmmov 0   ;;  %vm122_vm1 = vcmask 1044480   ;;  %vm118_vm2 = vcmask 80896  }
  0x35   :  { %710 = vmatprep.subr.bf16.mxu0 %v933_v0  ;;  %712 = vmatprep.mubr.msk.bf16.mxu0 %vm934_vm0, %v933_v0  ;;  %v763_v1 = vld [vmem:[#allocation2] sm:$0x1f]   ;;  %v491_v5 = vld [vmem:[%s1142_s2 + $0x8] sm:$0xf]  ;;  %v935_v7 = vmov 0   ;;  %vm201_vm9 = vcmask 130048  }
  0x36   :  { %716 = vmatprep.subr.bf16.mxu1 %v933_v0  ;;  %718 = vmatprep.mubr.msk.bf16.mxu1 %vm934_vm0, %v933_v0  ;;  %v124_v2 = vsel %vm122_vm1, %v763_v1, 0  ;;  %v764_v3 = vld [vmem:[%s1140_s0] sm:$0x3f]   ;;  %vm588_vm3 = vcmp.eq.s32.totalorder %v491_v5, 2  ;;  %vm493_vm4 = vcmp.eq.s32.totalorder %v491_v5, 0  ;;  %vm541_vm5 = vcmp.eq.s32.totalorder %v491_v5, 1 }
  0x37   :  { %711 = vmatpush3.bf16.msra.mxu0 %v124_v2  ;;  %v765_v4 = vld [vmem:[%s1145_s5] sm:$0xff]   ;;  %762 = vset.pattern.permute.xlu1 %v935_v7  ;;  %v936_v8 = vmov -1e+30   ;;  %v682_v15 = vld [vmem:[#allocation5] ss:$0 sm:$0xff]  ;;  %vm273_vm10 = vcmask 1045504  }
  0x38   :  { %722 = vmatprep.subr.bf16.mxu0 %v933_v0  ;;  %717 = vmatpush3.bf16.msra.mxu1 %v765_v4  ;;  %v490_v6 = vld [vmem:[%s1142_s2] sm:$0xff]  ;;  %v590_v9 = vsel %vm588_vm3, 0.0, %v936_v8  ;;  %v495_v10 = vsel %vm493_vm4, 0.0, %v936_v8  ;;  %v543_v11 = vsel %vm541_vm5, 0.0, %v936_v8  ;;  %vm269_vm11 = vcmask 97280   ;;  %v767_v43 = vld [vmem:[#allocation7] sm:$0xff]  }
  0x39   :  { %728 = vmatprep.subr.bf16.mxu1 %v933_v0  ;;  %761 = vset.pattern.permute.xlu0 %v935_v7  ;;  %vm492_vm6 = vcmp.eq.s32.totalorder %v490_v6, 0  ;;  %vm540_vm7 = vcmp.eq.s32.totalorder %v490_v6, 1  ;;  %vm587_vm8 = vcmp.eq.s32.totalorder %v490_v6, 2  ;;  %v1051_v42 = vld [vmem:[%s1141_s1] sm:$0x3f]   ;;  %vm508_vm12 = vcmask 1043456  }
  0x3a   :  { %713 = vmatmul.mubr.msk.bf16.vlgmr.msra.gmra.mxu0 %vm118_vm2, %v764_v3  ;;  %598 = vperm.xlu1 %762, %v590_v9   ;;  %v494_v12 = vsel %vm492_vm6, 0.0, %v936_v8  ;;  %v542_v13 = vsel %vm540_vm7, 0.0, %v936_v8  ;;  %v589_v14 = vsel %vm587_vm8, 0.0, %v936_v8  ;;  %v686_v44 = vld [vmem:[%s1146_s6] ss:$0 sm:$0xff]  ;;  %s938_s23 = smov [#allocation13]  }
  0x3b   :  { %724 = vmatprep.mubr.msk.bf16.mxu0 %vm934_vm0, %v933_v0  ;;  %503 = vperm.xlu0 %761, %v495_v10   ;;  %s661_s24 = sshll.u32 %s938_s23, 4  ;;  %s662_s24 = int_to_ptr.vmem [resolvable:$true] %s661_s24 }
  0x3e   :  { %498 = vperm.xlu1 %762, %v494_v12  }
  0x3f   :  { %551 = vperm.xlu0 %761, %v543_v11  }
  0x42   :  { %593 = vperm.xlu1 %762, %v589_v14  }
  0x43   :  { %546 = vperm.xlu0 %761, %v542_v13  }
  0xb5   :  { %v1067_v3 = vpop.permute.xlu1 %598 }
  0xb6   :  { %v1069_v4 = vpop.permute.xlu0 %503 }
  0xb9   :  { %v1073_v7 = vpop.permute.xlu1 %498 }
  0xba   :  { %v1071_v6 = vpop.permute.xlu0 %551 }
  0xbe   :  { %v1075_v14 = vpop.permute.xlu0 %546 }
  0xfa   :  { %v160_v16 = vpop.f32.mrf.mxu0 }
  0xfb   :  { %v161_v17 = vadd.f32 %v682_v15, %v160_v16 }
  0xfc   :  { %v714_v18 = vpop.f32.mrf.mxu0 }
  0xfd   :  { %v169_v19 = vmul.f32 0.044715, %v161_v17  ;;  %v167_v35 = vmul.f32 0.5, %v161_v17 }
  0xfe   :  { %v163_v20 = vpop.f32.mrf.mxu0 }
  0xff   :  { %v171_v21 = vmul.f32 %v169_v19, %v161_v17  ;;  %v164_v22 = vadd.f32 %v682_v15, %v163_v20  ;;  %v1077_v15 = vpop.permute.xlu1 %593 }
 0x100   :  { %v715_v23 = vpop.f32.mrf.mxu0 }
 0x101   :  { %v173_v24 = vmul.f32 %v171_v21, %v161_v17  ;;  %v170_v25 = vmul.f32 0.044715, %v164_v22  ;;  %v168_v36 = vmul.f32 0.5, %v164_v22 }
 0x103   :  { %v175_v26 = vadd.f32 %v173_v24, %v161_v17  ;;  %v172_v27 = vmul.f32 %v170_v25, %v164_v22 }
 0x105   :  { %v177_v28 = vmul.f32 0.7978846, %v175_v26  ;;  %v174_v29 = vmul.f32 %v172_v27, %v164_v22 }
 0x107   :  { %769 = vtanh.f32 %v177_v28  ;;  %v176_v30 = vadd.f32 %v174_v29, %v164_v22 }
 0x109   :  { %v178_v31 = vmul.f32 0.7978846, %v176_v30  ;;  %v691_v30 = vld [vmem:[#allocation8] ss:$0 sm:$0xff] }
 0x10b   :  { %771 = vtanh.f32 %v178_v31 }
 0x114   :  { %v770_v32 = vpop.eup %769 }
 0x115   :  { %v181_v33 = vadd.f32 1.0, %v770_v32 }
 0x117   :  { %v183_v38 = vmul.f32 %v181_v33, %v167_v35 }
 0x118   :  { %v772_v34 = vpop.eup %771 }
 0x119   :  { %v182_v37 = vadd.f32 1.0, %v772_v34 }
 0x11b   :  { %v184_v39 = vmul.f32 %v182_v37, %v168_v36 }
 0x11d   :  { %v185_v40 = vpack.c.bf16 %v184_v39, %v183_v38 }
 0x11f   :  { %719 = vmatmul.mubr.msk.bf16.vlgmr.msra.gmra.mxu1 %vm201_vm9, %v185_v40  ;;  %v274_v41 = vsel %vm273_vm10, %v185_v40, 0 }
 0x120   :  { %723 = vmatpush3.bf16.msra.mxu0 %v274_v41  ;;  %730 = vmatprep.mubr.msk.bf16.mxu1 %vm934_vm0, %v933_v0 }
 0x121   :  { %734 = vmatprep.subr.bf16.mxu0 %v933_v0  ;;  %729 = vmatpush3.bf16.msra.mxu1 %v767_v43 }
 0x122   :  { %740 = vmatprep.subr.bf16.mxu1 %v933_v0 }
 0x123   :  { %725 = vmatmul.mubr.msk.bf16.vlgmr.msra.gmra.mxu0 %vm269_vm11, %v1051_v42 }
 0x124   :  { %736 = vmatprep.mubr.msk.bf16.mxu0 %vm934_vm0, %v933_v0 }
 0x1df   :  { %v239_v45 = vpop.f32.mrf.mxu1 }
 0x1e0   :  { %v240_v46 = vadd.f32 %v686_v44, %v239_v45 }
 0x1e1   :  { %v720_v47 = vpop.f32.mrf.mxu1 }
 0x1e2   :  { %v248_v48 = vmul.f32 0.044715, %v240_v46  ;;  %v246_v10 = vmul.f32 0.5, %v240_v46 }
 0x1e3   :  { %v242_v49 = vpop.f32.mrf.mxu1  ;;  %v310_v50 = vpop.f32.mrf.mxu0 }
 0x1e4   :  { %v250_v51 = vmul.f32 %v248_v48, %v240_v46  ;;  %v243_v52 = vadd.f32 %v686_v44, %v242_v49 }
 0x1e5   :  { %v721_v53 = vpop.f32.mrf.mxu1  ;;  %v726_v54 = vpop.f32.mrf.mxu0 }
 0x1e6   :  { %v252_v55 = vmul.f32 %v250_v51, %v240_v46  ;;  %v249_v56 = vmul.f32 0.044715, %v243_v52  ;;  %v247_v11 = vmul.f32 0.5, %v243_v52 }
 0x1e7   :  { %v313_v57 = vpop.f32.mrf.mxu0 }
 0x1e8   :  { %v254_v58 = vadd.f32 %v252_v55, %v240_v46  ;;  %v251_v59 = vmul.f32 %v249_v56, %v243_v52  ;;  %v317_v60 = vpack.c.bf16 %v313_v57, %v310_v50 }
 0x1e9   :  { %v727_v61 = vpop.f32.mrf.mxu0 }
 0x1ea   :  { %v256_v62 = vmul.f32 0.7978846, %v254_v58  ;;  %v253_v63 = vmul.f32 %v251_v59, %v243_v52  ;;  %731 = vmatmul.mubr.msk.bf16.vlgmr.msra.gmra.mxu1 %vm201_vm9, %v317_v60 }
 0x1eb   :  { %742 = vmatprep.mubr.msk.bf16.mxu1 %vm934_vm0, %v933_v0 }
 0x1ec   :  { %773 = vtanh.f32 %v256_v62  ;;  %v255_v1 = vadd.f32 %v253_v63, %v243_v52 }
 0x1ee   :  { %v257_v2 = vmul.f32 0.7978846, %v255_v1 }
 0x1f0   :  { %775 = vtanh.f32 %v257_v2 }
 0x1f9   :  { %v774_v5 = vpop.eup %773 }
 0x1fa   :  { %v260_v8 = vadd.f32 1.0, %v774_v5 }
 0x1fc   :  { %v262_v13 = vmul.f32 %v260_v8, %v246_v10 }
 0x1fd   :  { %v776_v9 = vpop.eup %775 }
 0x1fe   :  { %v261_v12 = vadd.f32 1.0, %v776_v9  ;;  %v506_v19 = vadd.f32 %v1073_v7, %v262_v13  ;;  %v554_v20 = vadd.f32 %v1075_v14, %v262_v13  ;;  %v601_v21 = vadd.f32 %v1077_v15, %v262_v13 }
 0x200   :  { %v263_v0 = vmul.f32 %v261_v12, %v247_v11 }
 0x202   :  { %v602_v16 = vadd.f32 %v1067_v3, %v263_v0  ;;  %v507_v17 = vadd.f32 %v1069_v4, %v263_v0  ;;  %v555_v18 = vadd.f32 %v1071_v6, %v263_v0 }
 0x204   :  { %v509_v22 = vsel %vm508_vm12, %v507_v17, -inf  ;;  %v556_v23 = vsel %vm508_vm12, %v555_v18, -inf  ;;  %v603_v24 = vsel %vm508_vm12, %v602_v16, -inf }
 0x205   :  { %v510_v25 = vmax.f32 %v506_v19, %v509_v22  ;;  %v557_v26 = vmax.f32 %v554_v20, %v556_v23  ;;  %v604_v27 = vmax.f32 %v601_v21, %v603_v24 }
 0x207   :  { %v511_v28 = vrot.slane %v510_v25, 4  ;;  %v558_v29 = vrot.slane %v557_v26, 4  ;;  %v605_v35 = vrot.slane %v604_v27, 4 }
 0x209   :  { %v512_v33 = vmax.f32 %v510_v25, %v511_v28  ;;  %v559_v34 = vmax.f32 %v557_v26, %v558_v29  ;;  %v606_v43 = vmax.f32 %v604_v27, %v605_v35 }
 0x20b   :  { %v513_v40 = vrot.slane %v512_v33, 2  ;;  %v560_v41 = vrot.slane %v559_v34, 2  ;;  %v607_v57 = vrot.slane %v606_v43, 2 }
 0x20d   :  { %v514_v1 = vmax.f32 %v512_v33, %v513_v40  ;;  %v561_v2 = vmax.f32 %v559_v34, %v560_v41  ;;  %v608_v5 = vmax.f32 %v606_v43, %v607_v57 }
 0x20f   :  { %v562_v16 = vrot.slane %v561_v2, 1  ;;  %v609_v17 = vrot.slane %v608_v5, 1 }
 0x211   :  { %v563_v25 = vmax.f32 %v561_v2, %v562_v16  ;;  %v610_v26 = vmax.f32 %v608_v5, %v609_v17 }
 0x2aa   :  { %v370_v31 = vpop.f32.mrf.mxu1 }
 0x2ab   :  { %v371_v32 = vadd.f32 %v691_v30, %v370_v31 }
 0x2ac   :  { %v732_v36 = vpop.f32.mrf.mxu1 }
 0x2ad   :  { %v1088_v37 = vadd.f32 %v371_v32, %v262_v13  ;;  %v517_v49 = vadd.f32 %v1073_v7, %v371_v32  ;;  %v564_v50 = vadd.f32 %v1075_v14, %v371_v32  ;;  %v611_v51 = vadd.f32 %v1077_v15, %v371_v32 }
 0x2ae   :  { %v373_v38 = vpop.f32.mrf.mxu1 }
 0x2af   :  { %v374_v39 = vadd.f32 %v691_v30, %v373_v38 }
 0x2b0   :  { %v733_v44 = vpop.f32.mrf.mxu1 }
 0x2b1   :  { %v518_v45 = vadd.f32 %v1069_v4, %v374_v39  ;;  %v565_v46 = vadd.f32 %v1071_v6, %v374_v39  ;;  %v612_v47 = vadd.f32 %v1067_v3, %v374_v39  ;;  %v377_v48 = vpack.c.bf16 %v374_v39, %v371_v32  ;;  %v768_v32 = vld [vmem:[%s1149_s9] sm:$0xff]   ;;  %s937_s9 = smov [#allocation11]  }
 0x2b2   :  { %v1096_v52 = vadd.f32 %v374_v39, %v263_v0  ;;  %v515_v0 = vrot.slane %v514_v1, 1  ;;  %741 = vmatpush3.bf16.msra.mxu1 %v768_v32  ;;  %v695_v39 = vld [vmem:[%s1150_s10] ss:$0 sm:$0xff]  ;;  %s649_s22 = sshll.u32 %s937_s9, 4  ;;  %s650_s22 = int_to_ptr.vmem [resolvable:$true] %s649_s22 }
 0x2b3   :  { %v519_v53 = vsel %vm508_vm12, %v518_v45, -inf  ;;  %v566_v54 = vsel %vm508_vm12, %v565_v46, -inf  ;;  %v613_v55 = vsel %vm508_vm12, %v612_v47, -inf  ;;  %v379_v56 = vsel %vm273_vm10, %v377_v48, 0  ;;  %s857_s10 = scalar_lea.vmem %s650_s22, 256  ;;  %p862_p7 = scmp.lt.s32.totalorder %s650_s22, %s650_s22 }
 0x2b4   :  { %v520_v58 = vmax.f32 %v517_v49, %v519_v53  ;;  %v567_v59 = vmax.f32 %v564_v50, %v566_v54  ;;  %v614_v60 = vmax.f32 %v611_v51, %v613_v55  ;;  %735 = vmatpush3.bf16.msra.mxu0 %v379_v56  ;;  %v516_v24 = vmax.f32 %v514_v1, %v515_v0  ;;  %p858_p6 = scmp.ne.s32.totalorder %s650_s22, %s857_s10  ;;  %p863_p8 = scmp.lt.s32.totalorder %s857_s10, %s857_s10 }
 0x2b6   :  { %v521_v61 = vrot.slane %v520_v58, 4  ;;  %v568_v62 = vrot.slane %v567_v59, 4  ;;  %v615_v63 = vrot.slane %v614_v60, 4  ;;  %p864_p9 = por %p863_p8, %p862_p7 }
 0x2b7   :  { %737 = vmatmul.mubr.msk.bf16.vlgmr.msra.gmra.mxu0 %vm269_vm11, %v1051_v42 }
 0x2b8   :  { %v522_v8 = vmax.f32 %v520_v58, %v521_v61  ;;  %v569_v9 = vmax.f32 %v567_v59, %v568_v62  ;;  %v616_v10 = vmax.f32 %v614_v60, %v615_v63  ;;  %p865_p10 = pnand %p864_p9, %p858_p6 }
 0x2ba   :  { %v523_v11 = vrot.slane %v522_v8, 2  ;;  %v570_v12 = vrot.slane %v569_v9, 2  ;;  %v617_v13 = vrot.slane %v616_v10, 2 }
 0x2bc   :  { %v524_v18 = vmax.f32 %v522_v8, %v523_v11  ;;  %v571_v19 = vmax.f32 %v569_v9, %v570_v12  ;;  %v618_v20 = vmax.f32 %v616_v10, %v617_v13 }
 0x2be   :  { %v525_v21 = vrot.slane %v524_v18, 1  ;;  %v572_v22 = vrot.slane %v571_v19, 1  ;;  %v619_v23 = vrot.slane %v618_v20, 1 }
 0x2c0   :  { %v526_v42 = vmax.f32 %v524_v18, %v525_v21  ;;  %v573_v27 = vmax.f32 %v571_v19, %v572_v22  ;;  %v620_v28 = vmax.f32 %v618_v20, %v619_v23 }
 0x2c2   :  { %v1104_v29 = vadd.f32 %v526_v42, %v516_v24  ;;  %v1106_v30 = vadd.f32 %v573_v27, %v563_v25  ;;  %v1108_v31 = vadd.f32 %v620_v28, %v610_v26 }
 0x377   :  { %v415_v33 = vpop.f32.mrf.mxu0 }
 0x379   :  { %v738_v34 = vpop.f32.mrf.mxu0 }
 0x37b   :  { %v418_v35 = vpop.f32.mrf.mxu0 }
 0x37c   :  { %v422_v36 = vpack.c.bf16 %v418_v35, %v415_v33 }
 0x37d   :  { %v739_v38 = vpop.f32.mrf.mxu0 }
 0x37e   :  { %743 = vmatmul.mubr.msk.bf16.vlgmr.msra.gmra.mxu1 %vm201_vm9, %v422_v36 }
 0x43e   :  { %v475_v40 = vpop.f32.mrf.mxu1 }
 0x43f   :  { %v476_v41 = vadd.f32 %v695_v39, %v475_v40 }
 0x440   :  { %v744_v43 = vpop.f32.mrf.mxu1 }
 0x441   :  { %488 = vst [vmem:[#allocation13] sm:$0xff] %v476_v41  ;;  %v484_v44 = vadd.f32 %v1088_v37, %v476_v41  ;;  %v527_v37 = vadd.f32 %v1073_v7, %v476_v41  ;;  %v574_v53 = vadd.f32 %v1075_v14, %v476_v41  ;;  %v621_v54 = vadd.f32 %v1077_v15, %v476_v41 }
 0x442   :  { %v478_v45 = vpop.f32.mrf.mxu1 }
 0x443   :  { %v479_v46 = vadd.f32 %v695_v39, %v478_v45  ;;  %486 = vst [vmem:[#allocation11] sm:$0xff] %v484_v44 }
 0x444   :  { %v745_v47 = vpop.f32.mrf.mxu1 }
 0x445   :  { %v528_v48 = vadd.f32 %v1069_v4, %v479_v46  ;;  %v575_v49 = vadd.f32 %v1071_v6, %v479_v46  ;;  %v622_v50 = vadd.f32 %v1067_v3, %v479_v46  ;;  %489 = vst [vmem:[#allocation13 + $0x8] sm:$0xf] %v479_v46  ;;  %v485_v51 = vadd.f32 %v1096_v52, %v479_v46 }
 0x447   :  { %v529_v55 = vsel %vm508_vm12, %v528_v48, -inf  ;;  %v576_v56 = vsel %vm508_vm12, %v575_v49, -inf  ;;  %v623_v4 = vsel %vm508_vm12, %v622_v50, -inf  ;;  %487 = vst [vmem:[#allocation11 + $0x8] sm:$0xf] %v485_v51 }
 0x448   :  { %868 = shalt.err (!%p865_p10)
}
 0x449   :  { %s939_s4 = smov 128   ;;  %s940_s25 = smov 8   ;;  %v530_v3 = vmax.f32 %v527_v37, %v529_v55  ;;  %v577_v6 = vmax.f32 %v574_v53, %v576_v56  ;;  %v624_v7 = vmax.f32 %v621_v54, %v623_v4 }
 0x44a   :  { %655 = dma.vmem_to_hbm [thread:$0]  %s650_s22, 256, %s1152_s12, [#allocation12], %s939_s4, %s939_s4, %s940_s25  }
 0x44b   :  { %s877_s3 = scalar_lea.vmem %s662_s24, 256  ;;  %p882_p12 = scmp.lt.s32.totalorder %s662_s24, %s662_s24 }
 0x44c   :  { %p878_p11 = scmp.ne.s32.totalorder %s662_s24, %s877_s3  ;;  %p883_p13 = scmp.lt.s32.totalorder %s877_s3, %s877_s3 }
 0x44e   :  { %p884_p0 = por %p883_p13, %p882_p12 }
 0x450   :  { %p885_p1 = pnand %p884_p0, %p878_p11 }
 0x452   :  { %888 = shalt.err (!%p885_p1)
}
 0x453   :  { %667 = dma.vmem_to_hbm [thread:$0]  %s662_s24, 256, %s1153_s13, [#allocation12], %s939_s4, %s939_s4, %s940_s25   ;;  %v531_v14 = vrot.slane %v530_v3, 4  ;;  %v578_v15 = vrot.slane %v577_v6, 4  ;;  %v625_v52 = vrot.slane %v624_v7, 4 }
 0x454   :  { %s941_s12 = smov [#allocation10]  }
 0x455   :  { %v532_v57 = vmax.f32 %v530_v3, %v531_v14  ;;  %v579_v58 = vmax.f32 %v577_v6, %v578_v15  ;;  %v626_v59 = vmax.f32 %v624_v7, %v625_v52  ;;  %s640_s7 = sshll.u32 %s941_s12, 4  ;;  %s641_s7 = int_to_ptr.vmem [resolvable:$true] %s640_s7 }
 0x456   :  { %s897_s13 = scalar_lea.vmem %s641_s7, 64  ;;  %p902_p3 = scmp.lt.s32.totalorder %s641_s7, %s641_s7 }
 0x457   :  { %v533_v60 = vrot.slane %v532_v57, 2  ;;  %v580_v61 = vrot.slane %v579_v58, 2  ;;  %v627_v62 = vrot.slane %v626_v59, 2  ;;  %p898_p2 = scmp.ne.s32.totalorder %s641_s7, %s897_s13  ;;  %p903_p4 = scmp.lt.s32.totalorder %s897_s13, %s897_s13 }
 0x459   :  { %v534_v63 = vmax.f32 %v532_v57, %v533_v60  ;;  %v581_v1 = vmax.f32 %v579_v58, %v580_v61  ;;  %v628_v2 = vmax.f32 %v626_v59, %v627_v62  ;;  %p904_p5 = por %p903_p4, %p902_p3 }
 0x45b   :  { %v535_v5 = vrot.slane %v534_v63, 1  ;;  %v582_v8 = vrot.slane %v581_v1, 1  ;;  %v629_v9 = vrot.slane %v628_v2, 1  ;;  %p905_p6 = pnand %p904_p5, %p898_p2 }
 0x45d   :  { %v536_v10 = vmax.f32 %v534_v63, %v535_v5  ;;  %v583_v11 = vmax.f32 %v581_v1, %v582_v8  ;;  %v630_v12 = vmax.f32 %v628_v2, %v629_v9 }
 0x45f   :  { %v538_v13 = vadd.f32 %v1104_v29, %v536_v10  ;;  %v585_v0 = vadd.f32 %v1106_v30, %v583_v11  ;;  %v632_v16 = vadd.f32 %v1108_v31, %v630_v12 }
 0x461   :  { %539 = vst [vmem:[#allocation10] sm:$0x1] %v538_v13  ;;  %586 = vst [vmem:[#allocation10 + $0x1] sm:$0x1] %v585_v0 }
 0x462   :  { %633 = vst [vmem:[#allocation10 + $0x2] sm:$0x1] %v632_v16 }
 0x463   :  { %908 = shalt.err (!%p905_p6)
}
 0x464   :  { %643 = dma.vmem_to_hbm [thread:$0]  %s641_s7, 64, %s1151_s11, [#allocation4]  }
 0x465   :  { %923 = dma.done.wait [#allocation4], 64  }
 0x466   :  { %924 = vsyncadd [#allocation4], 4294967232 }
 0x467   :  { %925 = dma.done.wait [#allocation12], 512  }
 0x468   :  { %926 = vsyncadd [#allocation12], 4294966784 }
 0x469   :  { %677 = vsyncpa [#allocation3], 1 }
 0x46a   :  { %678 = vsyncpa [#allocation6], 1 }
 0x46b   :  { %679 = vsyncpa [#allocation9], 1 }
 0x46c   :  { %680 = vsyncpa [#allocation4], 1 }
 0x46d   :  { %681 = vsyncpa [#allocation12], 1 }

</bundles_post_ra>
